<compile_context>
chip_gen: v7x
topology: tpu7x:2x2x1
jax: 0.10.0
libtpu: 0.0.40
codegen_flags: <defaults>
</compile_context>

<pallas_src>
import functools

import jax
import jax.numpy as jnp
from jax.experimental import pallas as pl
from jax.experimental.pallas import tpu as pltpu

HID = 128  # hidden width (lane-aligned)


def _round_up(x, m):
    return ((x + m - 1) // m) * m


def _dueling_head_kernel(x_ref, w1_ref, b1_ref, w2_ref, b2_ref,
                         wh1_ref, bh1_ref, wh2_ref, bh2_ref,
                         head_ref, *, input_dim):
    """One batch tile: feature MLP + fused [value | advantage] head."""
    f32 = jnp.float32
    cdt = w2_ref.dtype  # MXU operand dtype (bf16 by default)

    # Layer 1: degenerate K=input_dim contraction done on the VPU as broadcast
    # FMAs (no MXU pass for ~1/16 of useful work).  w1 rows are f32 (1, 128).
    x = x_ref[...]                                   # (tile_b, input_dim) f32
    h = b1_ref[...]                                  # (1, 128) broadcasts
    for i in range(input_dim):                       # static, tiny
        h = h + x[:, i:i + 1] * w1_ref[i:i + 1, :]
    h = jnp.maximum(h, 0.0)

    # Layer 2: Linear(128, 128) + ReLU  (MXU, f32 accumulate)
    h = jnp.dot(h.astype(cdt), w2_ref[...], preferred_element_type=f32)
    h = jnp.maximum(h + b2_ref[...], 0.0)

    # Fused [value | advantage] stage 1: Linear(128, 256) + ReLU
    hh = jnp.dot(h.astype(cdt), wh1_ref[...], preferred_element_type=f32)
    hh = jnp.maximum(hh + bh1_ref[...], 0.0)

    # Block-diagonal stage 2: lane 0 = value, lanes 1..output_dim = advantages,
    # remaining lanes exactly zero by construction.
    head_ref[...] = (jnp.dot(hh.astype(cdt), wh2_ref[...],
                             preferred_element_type=f32) + bh2_ref[...])


def prepare_params(params, *, input_dim=2, output_dim=3,
                   param_dtype=jnp.bfloat16):
    """One-time fuse / pad / cast of raw (in, out)-layout Linear params."""
    f32 = jnp.float32
    outp = _round_up(1 + output_dim, 8)   # value lane + advantages + zero pad

    # Layer-1 weight stays f32 and unpadded: consumed on the VPU, not the MXU.
    w1 = params["w1"].astype(f32)                                   # (in, 128)
    w2 = params["w2"].astype(param_dtype)                           # (128, 128)

    # Fused head stage 1: [value | advantage]
    wh1 = jnp.concatenate([params["wv1"], params["wa1"]], axis=1)   # (128, 256)
    bh1 = jnp.concatenate([params["bv1"], params["ba1"]]).reshape(1, 2 * HID)

    # Block-diagonal head stage 2: (256, outp)
    wh2 = jnp.zeros((2 * HID, outp), f32)
    wh2 = wh2.at[:HID, 0:1].set(params["wv2"])
    wh2 = wh2.at[HID:, 1:1 + output_dim].set(params["wa2"])
    bh2 = jnp.zeros((1, outp), f32)
    bh2 = bh2.at[0, 0].set(params["bv2"][0])
    bh2 = bh2.at[0, 1:1 + output_dim].set(params["ba2"])

    return dict(
        w1=w1,
        b1=params["b1"].reshape(1, HID).astype(f32),
        w2=w2,
        b2=params["b2"].reshape(1, HID).astype(f32),
        wh1=wh1.astype(param_dtype),
        bh1=bh1.astype(f32),
        wh2=wh2.astype(param_dtype),
        bh2=bh2,
    )


def dueling_dqn_forward(state, prep, *, output_dim=3, tile_b_max=1024):
    """state: (B, input_dim) float32 -> qvals: (B, output_dim) float32."""
    B, in_dim = state.shape
    outp = prep["wh2"].shape[1]

    # Batch tiling: big lane/sublane-friendly tiles; weights stay resident.
    tile_b = min(tile_b_max, _round_up(max(B, 1), 8))
    tile_b = _round_up(tile_b, 8)
    num_tiles = -(-B // tile_b)
    Bp = num_tiles * tile_b

    x_p = jnp.pad(state.astype(jnp.float32), ((0, Bp - B), (0, 0)))

    operands = (x_p, prep["w1"], prep["b1"], prep["w2"], prep["b2"],
                prep["wh1"], prep["bh1"], prep["wh2"], prep["bh2"])

    def const_spec(a):  # weights/biases: same block every grid step
        return pl.BlockSpec(a.shape, lambda i: (0, 0))

    in_specs = [pl.BlockSpec((tile_b, in_dim), lambda i: (i, 0))]
    in_specs += [const_spec(a) for a in operands[1:]]

    # Pass 1: batch-tiled head computation (parallel grid axis -> both v7x TCs).
    head = pl.pallas_call(
        functools.partial(_dueling_head_kernel, input_dim=in_dim),
        out_shape=jax.ShapeDtypeStruct((Bp, outp), jnp.float32),
        grid=(num_tiles,),
        in_specs=in_specs,
        out_specs=pl.BlockSpec((tile_b, outp), lambda i: (i, 0)),
        compiler_params=pltpu.CompilerParams(
            dimension_semantics=("parallel",)),
    )(*operands)

    # Pass 2 (plain JAX, fuses under jit): global advantage mean + combine.
    v = head[:B, 0:1]
    a = head[:B, 1:1 + output_dim]
    a_mean = jnp.sum(a) * (1.0 / float(B * output_dim))  # baked-in reciprocal
    return v + (a - a_mean)


def init_params(key, input_dim=2, output_dim=3):
    """Deterministic PyTorch-Linear-style init, weights stored as (in, out)."""
    ks = jax.random.split(key, 12)

    def lin(kw, kb, fan_in, fan_out):
        bound = 1.0 / jnp.sqrt(jnp.float32(fan_in))
        w = jax.random.uniform(kw, (fan_in, fan_out), jnp.float32, -bound, bound)
        b = jax.random.uniform(kb, (fan_out,), jnp.float32, -bound, bound)
        return w, b

    w1, b1 = lin(ks[0], ks[1], input_dim, HID)
    w2, b2 = lin(ks[2], ks[3], HID, HID)
    wv1, bv1 = lin(ks[4], ks[5], HID, HID)
    wv2, bv2 = lin(ks[6], ks[7], HID, 1)
    wa1, ba1 = lin(ks[8], ks[9], HID, HID)
    wa2, ba2 = lin(ks[10], ks[11], HID, output_dim)
    return dict(w1=w1, b1=b1, w2=w2, b2=b2,
                wv1=wv1, bv1=bv1, wv2=wv2, bv2=bv2,
                wa1=wa1, ba1=ba1, wa2=wa2, ba2=ba2)


def reference_forward(state, p):
    """Exact float32 reference matching the PyTorch module."""
    relu = lambda z: jnp.maximum(z, 0.0)
    h = relu(state @ p["w1"] + p["b1"])
    h = relu(h @ p["w2"] + p["b2"])
    v = relu(h @ p["wv1"] + p["bv1"]) @ p["wv2"] + p["bv2"]   # (B, 1)
    a = relu(h @ p["wa1"] + p["ba1"]) @ p["wa2"] + p["ba2"]   # (B, out)
    return v + (a - jnp.mean(a))


def reference_forward_prepared(state, prep, *, output_dim=3):
    """Same arithmetic as the kernel: f32 VPU layer 1, bf16-rounded MXU operands."""
    f32 = jnp.float32
    cdt = prep["w2"].dtype
    relu = lambda z: jnp.maximum(z, 0.0)
    mm = lambda a, w: jnp.dot(a.astype(cdt).astype(f32), w.astype(f32))
    h = relu(state.astype(f32) @ prep["w1"] + prep["b1"])
    h = relu(mm(h, prep["w2"]) + prep["b2"])
    hh = relu(mm(h, prep["wh1"]) + prep["bh1"])
    head = mm(hh, prep["wh2"]) + prep["bh2"]
    v = head[:, 0:1]
    a = head[:, 1:1 + output_dim]
    return v + (a - jnp.mean(a))


if __name__ == "__main__":
    key = jax.random.PRNGKey(0)
    k_params, k_state, k_state2 = jax.random.split(key, 3)

    input_dim, output_dim, batch = 2, 3, 4
    params = init_params(k_params, input_dim, output_dim)
    prep = prepare_params(params, input_dim=input_dim, output_dim=output_dim)

    # --- MountainCar-sized batch (single tile), whole forward under one jit ---
    state = jax.random.normal(k_state, (batch, input_dim), jnp.float32)
    fwd = jax.jit(functools.partial(dueling_dqn_forward, output_dim=output_dim))
    q = jax.block_until_ready(fwd(state, prep))
    assert q.shape == (batch, output_dim)

    q_prep_ref = reference_forward_prepared(state, prep, output_dim=output_dim)
    assert jnp.allclose(q, q_prep_ref, atol=1e-4, rtol=1e-4), \
        "mismatch vs matched-precision reference (small batch)"
    q_f32_ref = reference_forward(state, params)
    assert jnp.allclose(q, q_f32_ref, atol=5e-2, rtol=5e-2), \
        "mismatch vs f32 reference (small batch)"

    # --- Multi-tile path (tile_b_max=8 forces 3 grid steps + JAX mean pass) ---
    batch2 = 20
    state2 = jax.random.normal(k_state2, (batch2, input_dim), jnp.float32)
    fwd_tiled = jax.jit(functools.partial(
        dueling_dqn_forward, output_dim=output_dim, tile_b_max=8))
    q2 = jax.block_until_ready(fwd_tiled(state2, prep))
    assert q2.shape == (batch2, output_dim)

    q2_prep_ref = reference_forward_prepared(state2, prep, output_dim=output_dim)
    assert jnp.allclose(q2, q2_prep_ref, atol=1e-4, rtol=1e-4), \
        "mismatch vs matched-precision reference (tiled batch)"
    q2_f32_ref = reference_forward(state2, params)
    assert jnp.allclose(q2, q2_f32_ref, atol=5e-2, rtol=5e-2), \
        "mismatch vs f32 reference (tiled batch)"

    print("KERNEL_OK")
</pallas_src>

<mosaic_0001>
module attributes {stable_mosaic.version = 11 : i64} {
  func.func @_dueling_head_kernel(%arg0: i32, %arg1: memref<8x2xf32, #tpu.memory_space<vmem>>, %arg2: memref<2x128xf32, #tpu.memory_space<vmem>>, %arg3: memref<1x128xf32, #tpu.memory_space<vmem>>, %arg4: memref<128x128xbf16, #tpu.memory_space<vmem>>, %arg5: memref<1x128xf32, #tpu.memory_space<vmem>>, %arg6: memref<128x256xbf16, #tpu.memory_space<vmem>>, %arg7: memref<1x256xf32, #tpu.memory_space<vmem>>, %arg8: memref<256x8xbf16, #tpu.memory_space<vmem>>, %arg9: memref<1x8xf32, #tpu.memory_space<vmem>>, %arg10: memref<8x8xf32, #tpu.memory_space<vmem>>) attributes {dimension_semantics = [#tpu.dimension_semantics<parallel>], iteration_bounds = array<i64: 1>, scalar_prefetch = 0 : i64, scratch_operands = 0 : i64, tpu.core_type = #tpu.core_type<tc>, window_params = [{transform_indices = @transform_0, window_bounds = array<i64: 8, 2>}, {pipeline_mode = #tpu.pipeline_mode<synchronous>, transform_indices = @transform_1, window_bounds = array<i64: 2, 128>}, {pipeline_mode = #tpu.pipeline_mode<synchronous>, transform_indices = @transform_2, window_bounds = array<i64: 1, 128>}, {pipeline_mode = #tpu.pipeline_mode<synchronous>, transform_indices = @transform_3, window_bounds = array<i64: 128, 128>}, {pipeline_mode = #tpu.pipeline_mode<synchronous>, transform_indices = @transform_4, window_bounds = array<i64: 1, 128>}, {pipeline_mode = #tpu.pipeline_mode<synchronous>, transform_indices = @transform_5, window_bounds = array<i64: 128, 256>}, {pipeline_mode = #tpu.pipeline_mode<synchronous>, transform_indices = @transform_6, window_bounds = array<i64: 1, 256>}, {pipeline_mode = #tpu.pipeline_mode<synchronous>, transform_indices = @transform_7, window_bounds = array<i64: 256, 8>}, {pipeline_mode = #tpu.pipeline_mode<synchronous>, transform_indices = @transform_8, window_bounds = array<i64: 1, 8>}, {transform_indices = @transform_9, window_bounds = array<i64: 8, 8>}]} {
    %c0 = arith.constant 0 : index
    %c0_0 = arith.constant 0 : index
    %0 = vector.load %arg1[%c0, %c0_0] : memref<8x2xf32, #tpu.memory_space<vmem>>, vector<8x2xf32>
    %c0_1 = arith.constant 0 : index
    %c0_2 = arith.constant 0 : index
    %1 = vector.load %arg3[%c0_1, %c0_2] : memref<1x128xf32, #tpu.memory_space<vmem>>, vector<1x128xf32>
    %2 = vector.extract_strided_slice %0 {offsets = [0, 0], sizes = [8, 1], strides = [1, 1]} : vector<8x2xf32> to vector<8x1xf32>
    %c0_3 = arith.constant 0 : index
    %c0_4 = arith.constant 0 : index
    %3 = vector.load %arg2[%c0_3, %c0_4] : memref<2x128xf32, #tpu.memory_space<vmem>>, vector<1x128xf32>
    %4 = vector.broadcast %2 : vector<8x1xf32> to vector<8x128xf32>
    %5 = vector.broadcast %3 : vector<1x128xf32> to vector<8x128xf32>
    %6 = arith.mulf %4, %5 : vector<8x128xf32>
    %7 = vector.broadcast %1 : vector<1x128xf32> to vector<8x128xf32>
    %8 = arith.addf %7, %6 : vector<8x128xf32>
    %9 = vector.extract_strided_slice %0 {offsets = [0, 1], sizes = [8, 1], strides = [1, 1]} : vector<8x2xf32> to vector<8x1xf32>
    %c1 = arith.constant 1 : index
    %c0_5 = arith.constant 0 : index
    %10 = vector.load %arg2[%c1, %c0_5] : memref<2x128xf32, #tpu.memory_space<vmem>>, vector<1x128xf32>
    %11 = vector.broadcast %9 : vector<8x1xf32> to vector<8x128xf32>
    %12 = vector.broadcast %10 : vector<1x128xf32> to vector<8x128xf32>
    %13 = arith.mulf %11, %12 : vector<8x128xf32>
    %14 = arith.addf %8, %13 : vector<8x128xf32>
    %cst = arith.constant 0.000000e+00 : f32
    %15 = vector.broadcast %cst : f32 to vector<8x128xf32>
    %16 = arith.maximumf %14, %15 : vector<8x128xf32>
    %17 = arith.truncf %16 : vector<8x128xf32> to vector<8x128xbf16>
    %c0_6 = arith.constant 0 : index
    %c0_7 = arith.constant 0 : index
    %18 = vector.load %arg4[%c0_6, %c0_7] : memref<128x128xbf16, #tpu.memory_space<vmem>>, vector<128x128xbf16>
    %cst_8 = arith.constant dense<0.000000e+00> : vector<8x128xf32>
    %19 = tpu.matmul %17, %18, %cst_8 {dimension_numbers = #tpu.dot_dimension_numbers<[1], [0], [0], [1], [0, 0, 1, 1], [], []>} : vector<8x128xbf16>, vector<128x128xbf16>, vector<8x128xf32> -> vector<8x128xf32>
    %c0_9 = arith.constant 0 : index
    %c0_10 = arith.constant 0 : index
    %20 = vector.load %arg5[%c0_9, %c0_10] : memref<1x128xf32, #tpu.memory_space<vmem>>, vector<1x128xf32>
    %21 = vector.broadcast %20 : vector<1x128xf32> to vector<8x128xf32>
    %22 = arith.addf %19, %21 : vector<8x128xf32>
    %cst_11 = arith.constant 0.000000e+00 : f32
    %23 = vector.broadcast %cst_11 : f32 to vector<8x128xf32>
    %24 = arith.maximumf %22, %23 : vector<8x128xf32>
    %25 = arith.truncf %24 : vector<8x128xf32> to vector<8x128xbf16>
    %c0_12 = arith.constant 0 : index
    %c0_13 = arith.constant 0 : index
    %26 = vector.load %arg6[%c0_12, %c0_13] : memref<128x256xbf16, #tpu.memory_space<vmem>>, vector<128x256xbf16>
    %cst_14 = arith.constant dense<0.000000e+00> : vector<8x256xf32>
    %27 = tpu.matmul %25, %26, %cst_14 {dimension_numbers = #tpu.dot_dimension_numbers<[1], [0], [0], [1], [0, 0, 1, 1], [], []>} : vector<8x128xbf16>, vector<128x256xbf16>, vector<8x256xf32> -> vector<8x256xf32>
    %c0_15 = arith.constant 0 : index
    %c0_16 = arith.constant 0 : index
    %28 = vector.load %arg7[%c0_15, %c0_16] : memref<1x256xf32, #tpu.memory_space<vmem>>, vector<1x256xf32>
    %29 = vector.broadcast %28 : vector<1x256xf32> to vector<8x256xf32>
    %30 = arith.addf %27, %29 : vector<8x256xf32>
    %cst_17 = arith.constant 0.000000e+00 : f32
    %31 = vector.broadcast %cst_17 : f32 to vector<8x256xf32>
    %32 = arith.maximumf %30, %31 : vector<8x256xf32>
    %33 = arith.truncf %32 : vector<8x256xf32> to vector<8x256xbf16>
    %c0_18 = arith.constant 0 : index
    %c0_19 = arith.constant 0 : index
    %34 = vector.load %arg8[%c0_18, %c0_19] : memref<256x8xbf16, #tpu.memory_space<vmem>>, vector<256x8xbf16>
    %cst_20 = arith.constant dense<0.000000e+00> : vector<8x8xf32>
    %35 = tpu.matmul %33, %34, %cst_20 {dimension_numbers = #tpu.dot_dimension_numbers<[1], [0], [0], [1], [0, 0, 1, 1], [], []>} : vector<8x256xbf16>, vector<256x8xbf16>, vector<8x8xf32> -> vector<8x8xf32>
    %c0_21 = arith.constant 0 : index
    %c0_22 = arith.constant 0 : index
    %36 = vector.load %arg9[%c0_21, %c0_22] : memref<1x8xf32, #tpu.memory_space<vmem>>, vector<1x8xf32>
    %37 = vector.broadcast %36 : vector<1x8xf32> to vector<8x8xf32>
    %38 = arith.addf %35, %37 : vector<8x8xf32>
    %c0_23 = arith.constant 0 : index
    %c0_24 = arith.constant 0 : index
    %39 = vector.load %arg10[%c0_23, %c0_24] : memref<8x8xf32, #tpu.memory_space<vmem>>, vector<8x8xf32>
    tpu.vector_store %arg10[%c0_23, %c0_24], %38 {strides = array<i32>} : memref<8x8xf32, #tpu.memory_space<vmem>>, vector<8x8xf32>,
    return
  }
  func.func @transform_0(%arg0: i32) -> (i32, i32) {
    %c0_i32 = arith.constant 0 : i32
    %c0_i32_0 = arith.constant 0 : i32
    return %arg0, %c0_i32 : i32, i32
  }
  func.func @transform_1(%arg0: i32) -> (i32, i32) {
    %c0_i32 = arith.constant 0 : i32
    %c0_i32_0 = arith.constant 0 : i32
    %c0_i32_1 = arith.constant 0 : i32
    return %c0_i32, %c0_i32_0 : i32, i32
  }
  func.func @transform_2(%arg0: i32) -> (i32, i32) {
    %c0_i32 = arith.constant 0 : i32
    %c0_i32_0 = arith.constant 0 : i32
    %c0_i32_1 = arith.constant 0 : i32
    return %c0_i32, %c0_i32_0 : i32, i32
  }
  func.func @transform_3(%arg0: i32) -> (i32, i32) {
    %c0_i32 = arith.constant 0 : i32
    %c0_i32_0 = arith.constant 0 : i32
    %c0_i32_1 = arith.constant 0 : i32
    return %c0_i32, %c0_i32_0 : i32, i32
  }
  func.func @transform_4(%arg0: i32) -> (i32, i32) {
    %c0_i32 = arith.constant 0 : i32
    %c0_i32_0 = arith.constant 0 : i32
    %c0_i32_1 = arith.constant 0 : i32
    return %c0_i32, %c0_i32_0 : i32, i32
  }
  func.func @transform_5(%arg0: i32) -> (i32, i32) {
    %c0_i32 = arith.constant 0 : i32
    %c0_i32_0 = arith.constant 0 : i32
    %c0_i32_1 = arith.constant 0 : i32
    return %c0_i32, %c0_i32_0 : i32, i32
  }
  func.func @transform_6(%arg0: i32) -> (i32, i32) {
    %c0_i32 = arith.constant 0 : i32
    %c0_i32_0 = arith.constant 0 : i32
    %c0_i32_1 = arith.constant 0 : i32
    return %c0_i32, %c0_i32_0 : i32, i32
  }
  func.func @transform_7(%arg0: i32) -> (i32, i32) {
    %c0_i32 = arith.constant 0 : i32
    %c0_i32_0 = arith.constant 0 : i32
    %c0_i32_1 = arith.constant 0 : i32
    return %c0_i32, %c0_i32_0 : i32, i32
  }
  func.func @transform_8(%arg0: i32) -> (i32, i32) {
    %c0_i32 = arith.constant 0 : i32
    %c0_i32_0 = arith.constant 0 : i32
    %c0_i32_1 = arith.constant 0 : i32
    return %c0_i32, %c0_i32_0 : i32, i32
  }
  func.func @transform_9(%arg0: i32) -> (i32, i32) {
    %c0_i32 = arith.constant 0 : i32
    %c0_i32_0 = arith.constant 0 : i32
    return %arg0, %c0_i32 : i32, i32
  }
}

</mosaic_0001>

<bundles_post_ra>
// kernel: dueling_dqn_forward.1
= control target key start
LH: loop header
LB: loop body
LE: loop exit
PB: predicated region body
PF: predicated region fallthrough
CT: control target
= control target key end

     0   :  { %14 = vsyncpa [#allocation3], 0  ;;  %s705_s30 = smov [#allocation2]   ;;  %s894_s0 = inlined_call_operand.vmem [shape: f32[8,2], index: 0, kind: input, shape index: {}]   ;;  %s895_s1 = inlined_call_operand.vmem [shape: f32[2,128], index: 1, kind: input, shape index: {}]   ;;  %s896_s2 = inlined_call_operand.vmem [shape: f32[1,128], index: 2, kind: input, shape index: {}]   ;;  %s897_s3 = inlined_call_operand.hbm [shape: bf16[128,128], index: 3, kind: input, shape index: {}]   ;;  %s898_s4 = inlined_call_operand.vmem [shape: f32[1,128], index: 4, kind: input, shape index: {}]   ;;  %s899_s5 = inlined_call_operand.vmem [shape: bf16[128,256], index: 5, kind: input, shape index: {}]   ;;  %s900_s6 = inlined_call_operand.vmem [shape: f32[1,256], index: 6, kind: input, shape index: {}]   ;;  %s901_s7 = inlined_call_operand.vmem [shape: bf16[256,8], index: 7, kind: input, shape index: {}]   ;;  %s902_s8 = inlined_call_operand.vmem [shape: f32[1,8], index: 8, kind: input, shape index: {}]   ;;  %s903_s9 = inlined_call_operand.vmem [shape: f32[8,8], index: 9, kind: output, shape index: {}]  }
   0x1   :  { %s26_s10 = sshll.u32 %s705_s30, 4  ;;  %s681_s13 = scalar_lea.hbm %s897_s3, 1024  ;;  %s27_s10 = int_to_ptr.vmem [resolvable:$true] %s26_s10 }
   0x2   :  { %p682_p0 = scmp.ne.s32.totalorder %s897_s3, %s681_s13  ;;  %p685_p1 = scmp.lt.u32.totalorder %s681_s13, %s897_s3 }
   0x4   :  { %p687_p2 = pnand %p685_p1, %p682_p0 }
   0x6   :  { %690 = shalt.err (!%p687_p2)
}
   0x7   :  { %s691_s18 = scalar_lea.vmem %s27_s10, 1024  ;;  %p696_p4 = scmp.lt.s32.totalorder %s27_s10, %s27_s10 }
   0x8   :  { %p692_p3 = scmp.ne.s32.totalorder %s27_s10, %s691_s18  ;;  %p697_p5 = scmp.lt.s32.totalorder %s691_s18, %s691_s18 }
   0xa   :  { %p698_p6 = por %p697_p5, %p696_p4 }
   0xc   :  { %p699_p7 = pnand %p698_p6, %p692_p3 }
   0xe   :  { %702 = shalt.err (!%p699_p7)
}
   0xf   :  { %s706_s19 = smov 64   ;;  %s707_s20 = smov 4  }
  0x10   :  { %32 = dma.hbm_to_vmem [thread:$0]  %s897_s3, 1024, %s27_s10, [#allocation3], %s706_s19, %s706_s19, %s707_s20  }
  0x11   :  { %703 = dma.done.wait [#allocation3], 1024  }
  0x12   :  { %704 = vsyncadd [#allocation3], 4294966272  ;;  %v708_v0 = vmov 0   ;;  %v709_v1 = vmov 0.0   ;;  %v47_v2 = vld [vmem:[%s894_s0] sm:$0xff]  ;;  %v633_v3 = vld [vmem:[#allocation2] sm:$0xff]   ;;  %v211_v63 = vlaneseq }
  0x13   :  { %631 = vset.pattern.permute.xlu0 %v708_v0  ;;  %604 = vmatprep.subr.bf16.mxu0 %v709_v1  ;;  %v634_v4 = vld [vmem:[#allocation2 + $0x8] sm:$0xff]   ;;  %v710_v5 = vmov 1   ;;  %v635_v6 = vld [vmem:[#allocation2 + $0x10] sm:$0xff]   ;;  %v636_v7 = vld [vmem:[#allocation2 + $0x18] sm:$0xff]   ;;  %vm711_vm0 = vmmov 0   ;;  %vm521_vm1 = vcmask 64512  }
  0x14   :  { %333 = vmatprep.mubr.bf16.mxu1 %v708_v0  ;;  %52 = vperm.xlu0 %631, %v47_v2   ;;  %v641_v8 = vld [vmem:[%s899_s5 + $0x4] ss:$8 sps:$4 sm:$0xff]   ;;  %v643_v9 = vld [vmem:[%s899_s5] ss:$8 sps:$4 sm:$0xff]   ;;  %v644_v10 = vld [vmem:[%s899_s5 + $0x14] ss:$8 sps:$4 sm:$0xff]  }
  0x15   :  { %605 = vmatpush3.bf16.msra.mxu0 %v633_v3  ;;  %620 = vmatprep.mubr.msk.bf16.mxu0 %vm711_vm0, %v709_v1  ;;  %v637_v11 = vld [vmem:[#allocation2 + $0x20] sm:$0xff]   ;;  %v646_v12 = vld [vmem:[%s899_s5 + $0x10] ss:$8 sps:$4 sm:$0xff]   ;;  %v650_v16 = vld [vmem:[%s899_s5 + $0x34] ss:$8 sps:$4 sm:$0xff]   ;;  %v212_v0 = vshrl.u32 %v211_v63, 7 }
  0x16   :  { %606 = vmatprep.subr.bf16.mxu0 %v709_v1  ;;  %301 = vmatprep.subr.bf16.mxu1 %v641_v8  ;;  %v638_v13 = vld [vmem:[#allocation2 + $0x28] sm:$0xff]   ;;  %v647_v14 = vld [vmem:[%s899_s5 + $0x24] ss:$8 sps:$4 sm:$0xff]   ;;  %v649_v15 = vld [vmem:[%s899_s5 + $0x20] ss:$8 sps:$4 sm:$0xff]  }
  0x17   :  { %302 = vmatpush1.bf16.msra.mxu1 %v643_v9  ;;  %v639_v17 = vld [vmem:[#allocation2 + $0x30] sm:$0xff]   ;;  %v653_v19 = vld [vmem:[%s899_s5 + $0x44] ss:$8 sps:$4 sm:$0xff]   ;;  %v655_v21 = vld [vmem:[%s899_s5 + $0x40] ss:$8 sps:$4 sm:$0xff]   ;;  %v217_v3 = vsub.s32 1, %v212_v0 }
  0x18   :  { %632 = vset.pattern.permute.xlu0 %v710_v5  ;;  %303 = vmatprep.subr.bf16.mxu1 %v644_v10  ;;  %v652_v18 = vld [vmem:[%s899_s5 + $0x30] ss:$8 sps:$4 sm:$0xff]   ;;  %v640_v20 = vld [vmem:[#allocation2 + $0x38] sm:$0xff]   ;;  %v656_v22 = vld [vmem:[%s899_s5 + $0x54] ss:$8 sps:$4 sm:$0xff]  }
  0x19   :  { %69 = vperm.xlu0 %632, %v47_v2   ;;  %607 = vmatpush3.bf16.msra.mxu0 %v634_v4  ;;  %v658_v23 = vld [vmem:[%s899_s5 + $0x50] ss:$8 sps:$4 sm:$0xff]   ;;  %v659_v24 = vld [vmem:[%s899_s5 + $0x64] ss:$8 sps:$4 sm:$0xff]   ;;  %v528_v25 = vld [vmem:[%s895_s1] ss:$0 sm:$0xff] }
  0x1a   :  { %608 = vmatprep.subr.bf16.mxu0 %v709_v1  ;;  %v529_v28 = vld [vmem:[%s896_s2] ss:$0 sm:$0xff]  ;;  %v530_v29 = vld [vmem:[%s895_s1 + $0x1] ss:$0 sm:$0xff]  ;;  %v662_v37 = vld [vmem:[%s899_s5 + $0x74] ss:$8 sps:$4 sm:$0xff]  }
  0x1b   :  { %304 = vmatpush1.bf16.msra.mxu1 %v646_v12  ;;  %v661_v36 = vld [vmem:[%s899_s5 + $0x60] ss:$8 sps:$4 sm:$0xff]   ;;  %v664_v38 = vld [vmem:[%s899_s5 + $0x70] ss:$8 sps:$4 sm:$0xff]  }
  0x1c   :  { %305 = vmatprep.subr.bf16.mxu1 %v647_v14  ;;  %v665_v39 = vld [vmem:[%s901_s7 + $0x40] sm:$0xff]   ;;  %v667_v41 = vld [vmem:[%s901_s7 + $0x48] sm:$0xff]   ;;  %v669_v43 = vld [vmem:[%s901_s7 + $0x50] sm:$0xff]  }
  0x1d   :  { %609 = vmatpush3.bf16.msra.mxu0 %v635_v6  ;;  %v666_v40 = vld [vmem:[%s901_s7] sm:$0xff]   ;;  %v668_v42 = vld [vmem:[%s901_s7 + $0x8] sm:$0xff]   ;;  %v670_v44 = vld [vmem:[%s901_s7 + $0x10] sm:$0xff]  }
  0x1e   :  { %610 = vmatprep.subr.bf16.mxu0 %v709_v1  ;;  %v671_v45 = vld [vmem:[%s901_s7 + $0x58] sm:$0xff]   ;;  %v673_v47 = vld [vmem:[%s901_s7 + $0x60] sm:$0xff]   ;;  %v675_v49 = vld [vmem:[%s901_s7 + $0x68] sm:$0xff]  }
  0x1f   :  { %306 = vmatpush1.bf16.msra.mxu1 %v649_v15  ;;  %v672_v46 = vld [vmem:[%s901_s7 + $0x18] sm:$0xff]   ;;  %v674_v48 = vld [vmem:[%s901_s7 + $0x20] sm:$0xff]   ;;  %v676_v50 = vld [vmem:[%s901_s7 + $0x28] sm:$0xff]  }
  0x20   :  { %307 = vmatprep.subr.bf16.mxu1 %v650_v16  ;;  %v531_v51 = vld [vmem:[%s898_s4] ss:$0 sm:$0xff]  ;;  %v677_v59 = vld [vmem:[%s901_s7 + $0x70] sm:$0xff]   ;;  %v679_v61 = vld [vmem:[%s901_s7 + $0x78] sm:$0xff]  }
  0x21   :  { %611 = vmatpush3.bf16.msra.mxu0 %v636_v7  ;;  %v678_v60 = vld [vmem:[%s901_s7 + $0x30] sm:$0xff]   ;;  %v680_v62 = vld [vmem:[%s901_s7 + $0x38] sm:$0xff]   ;;  %v209_v2 = vld [vmem:[%s900_s6] sm:$0x3] }
  0x22   :  { %612 = vmatprep.subr.bf16.mxu0 %v709_v1  ;;  %v218_v5 = vrot.slane %v209_v2, %v217_v3 }
  0x23   :  { %308 = vmatpush1.bf16.msra.mxu1 %v652_v18 }
  0x24   :  { %309 = vmatprep.subr.bf16.mxu1 %v653_v19 }
  0x25   :  { %613 = vmatpush3.bf16.msra.mxu0 %v637_v11 }
  0x26   :  { %614 = vmatprep.subr.bf16.mxu0 %v709_v1 }
  0x27   :  { %310 = vmatpush1.bf16.msra.mxu1 %v655_v21 }
  0x28   :  { %311 = vmatprep.subr.bf16.mxu1 %v656_v22 }
  0x29   :  { %615 = vmatpush3.bf16.msra.mxu0 %v638_v13 }
  0x2a   :  { %616 = vmatprep.subr.bf16.mxu0 %v709_v1 }
  0x2b   :  { %312 = vmatpush1.bf16.msra.mxu1 %v658_v23 }
  0x2c   :  { %313 = vmatprep.subr.bf16.mxu1 %v659_v24 }
  0x2d   :  { %617 = vmatpush3.bf16.msra.mxu0 %v639_v17  ;;  %v556_v17 = vld [vmem:[%s902_s8] ss:$0 sm:$0xff] }
  0x2e   :  { %618 = vmatprep.subr.bf16.mxu0 %v709_v1  ;;  %v213_v1 = vsub.s32 0, %v212_v0 }
  0x2f   :  { %314 = vmatpush1.bf16.msra.mxu1 %v661_v36 }
  0x30   :  { %315 = vmatprep.subr.bf16.mxu1 %v662_v37  ;;  %v214_v4 = vrot.slane %v209_v2, %v213_v1 }
  0x31   :  { %619 = vmatpush3.bf16.msra.mxu0 %v640_v20 }
  0x32   :  { %582 = vmatprep.subr.bf16.mxu0 %v665_v39 }
  0x33   :  { %316 = vmatpush1.bf16.msra.mxu1 %v664_v38 }
  0x93   :  { %v53_v26 = vpop.permute.xlu0 %52 }
  0x94   :  { %v59_v27 = vmul.f32 %v528_v25, %v53_v26 }
  0x96   :  { %v66_v31 = vadd.f32 %v529_v28, %v59_v27 }
  0x98   :  { %v70_v30 = vpop.permute.xlu0 %69 }
  0x99   :  { %v76_v32 = vmul.f32 %v530_v29, %v70_v30 }
  0x9b   :  { %v77_v33 = vadd.f32 %v76_v32, %v66_v31 }
  0x9d   :  { %v78_v34 = vmax.f32 %v77_v33, 0.0 }
  0x9f   :  { %v79_v35 = vpack.c.bf16 %v78_v34, %v78_v34 }
  0xa1   :  { %621 = vmatmul.mubr.bf16.vlgmr.msra.gmra.mrb[0].mxu0 %v79_v35 }
  0xa2   :  { %583 = vmatpush3.bf16.msra.mxu0 %v666_v40 }
  0xa3   :  { %584 = vmatprep.subr.bf16.mxu0 %v667_v41 }
  0xa6   :  { %585 = vmatpush3.bf16.msra.mxu0 %v668_v42 }
  0xa7   :  { %586 = vmatprep.subr.bf16.mxu0 %v669_v43 }
  0xaa   :  { %587 = vmatpush3.bf16.msra.mxu0 %v670_v44 }
  0xab   :  { %588 = vmatprep.subr.bf16.mxu0 %v671_v45 }
  0xae   :  { %589 = vmatpush3.bf16.msra.mxu0 %v672_v46 }
  0xaf   :  { %590 = vmatprep.subr.bf16.mxu0 %v673_v47 }
  0xb2   :  { %591 = vmatpush3.bf16.msra.mxu0 %v674_v48 }
  0xb3   :  { %592 = vmatprep.subr.bf16.mxu0 %v675_v49 }
  0xb6   :  { %593 = vmatpush3.bf16.msra.mxu0 %v676_v50 }
  0xb7   :  { %594 = vmatprep.subr.bf16.mxu0 %v677_v59 }
  0xba   :  { %595 = vmatpush3.bf16.msra.mxu0 %v678_v60 }
  0xbb   :  { %596 = vmatprep.subr.bf16.mxu0 %v679_v61 }
  0xbe   :  { %597 = vmatpush3.bf16.msra.mxu0 %v680_v62 }
 0x174   :  { %v185_v52 = vpop.f32.mrb[0].mxu0 }
 0x175   :  { %v186_v53 = vadd.f32 %v531_v51, %v185_v52  ;;  %v622_v54 = vpop.f32.mrb[1].mxu0 }
 0x176   :  { %v188_v55 = vpop.f32.mrb[2].mxu0 }
 0x177   :  { %v191_v56 = vmax.f32 %v186_v53, 0.0  ;;  %v623_v57 = vpop.f32.mrb[3].mxu0 }
 0x179   :  { %v192_v58 = vpack.c.bf16 %v191_v56, %v191_v56 }
 0x17b   :  { %334 = vmatmul.mubr.bf16.vlgmr.msra.gmra.mrb[0].mxu1 %v192_v58 }
 0x24e   :  { %v335_v6 = vpop.f32.mrb[0].mxu1 }
 0x24f   :  { %v336_v7 = vadd.f32 %v335_v6, %v214_v4  ;;  %v337_v8 = vpop.f32.mrb[1].mxu1 }
 0x250   :  { %v338_v9 = vadd.f32 %v337_v8, %v218_v5  ;;  %v339_v10 = vpop.f32.mrb[2].mxu1 }
 0x251   :  { %v342_v11 = vmax.f32 %v336_v7, 0.0  ;;  %v340_v12 = vpop.f32.mrb[3].mxu1 }
 0x252   :  { %v343_v13 = vmax.f32 %v338_v9, 0.0 }
 0x253   :  { %v344_v15 = vpack.c.bf16 %v342_v11, %v342_v11 }
 0x254   :  { %v345_v14 = vpack.c.bf16 %v343_v13, %v343_v13 }
 0x256   :  { %513 = vmatprep.mubr.bf16.mxu0 %v345_v14 }
 0x257   :  { %514 = vmatmul.mubr.bf16.vlgmr.msra.gmra.mrb[4].mxu0 %v344_v15 }
 0x32a   :  { %v598_v16 = vpop.f32.mrb[4].mxu0 }
 0x32b   :  { %v599_v18 = vpop.f32.mrb[5].mxu0 }
 0x32c   :  { %v600_v19 = vadd.f32 %v599_v18, %v598_v16  ;;  %v601_v20 = vpop.f32.mrb[6].mxu0 }
 0x32d   :  { %v602_v21 = vpop.f32.mrb[7].mxu0 }
 0x32e   :  { %v516_v22 = vadd.f32 %v600_v19, %v556_v17 }
 0x330   :  { %522 = vst.msk [vmem:[%s903_s9] sm:$0xff] %vm521_vm1, %v516_v22 }
 0x331   :  { %527 = vsyncpa [#allocation3], 1 }

</bundles_post_ra>
